<compile_context>
chip_gen: v7x
topology: tpu7x:2x2x1
jax: 0.10.0
libtpu: 0.0.40
codegen_flags: <defaults>
</compile_context>

<pallas_src>
import functools
import math

import jax
import jax.numpy as jnp
from jax.experimental import pallas as pl
from jax.experimental.pallas import tpu as pltpu


ACT_DTYPE = jnp.bfloat16   # activation / weight storage dtype (f32 accumulation)


# ------------------------------ helpers ------------------------------------

def _choose_rows(M, target=512):
    """Pick a row tile (multiple of 8 when tiling) and the padded row count."""
    bm = min(target, M)
    if bm < M and bm >= 8:
        bm -= bm % 8
    Mp = -(-M // bm) * bm
    return bm, Mp


def _pad_rows(x2d, Mp):
    M = x2d.shape[0]
    if Mp == M:
        return x2d
    return jnp.pad(x2d, ((0, Mp - M), (0, 0)))


# ----------------------------- Pallas kernels ------------------------------

def _conv_kernel(x_ref, w_ref, b_ref, o_ref):
    # per-position matmul: (bm, 4E) @ (4E, E) + b
    acc = jnp.dot(x_ref[...], w_ref[...], preferred_element_type=jnp.float32)
    o_ref[...] = (acc + b_ref[...]).astype(o_ref.dtype)


def _ln_qkv_kernel(x_ref, g_ref, b_ref, wqkv_ref, bqkv_ref, o_ref, *, eps):
    # fused: LayerNorm (f32 stats) + QKV projection -> lane-dense (bm, 3E) slab
    x = x_ref[...].astype(jnp.float32)
    mu = jnp.mean(x, axis=-1, keepdims=True)
    var = jnp.mean(jnp.square(x - mu), axis=-1, keepdims=True)
    h = (x - mu) * jax.lax.rsqrt(var + eps) * g_ref[...] + b_ref[...]
    acc = jnp.dot(h.astype(wqkv_ref.dtype), wqkv_ref[...],
                  preferred_element_type=jnp.float32)
    o_ref[...] = (acc + bqkv_ref[...]).astype(o_ref.dtype)


def _attn_kernel(x_ref, qkv_ref, m_ref, wo_ref, bo_ref, o_ref, *, n_heads, scale):
    # one batch element per grid step: all heads + output projection + residual
    L = qkv_ref.shape[1]
    E = x_ref.shape[2]
    dh = E // n_heads

    qkv = qkv_ref[0].astype(jnp.float32)          # (L, 3E)
    mask = m_ref[0]                               # (1, L); 1.0 = valid, 0.0 = pad
    neg = (1.0 - mask) * (-1e9)                   # additive key mask

    heads = []
    for h in range(n_heads):                      # static unroll over heads
        q = qkv[:, h * dh:(h + 1) * dh]           # (L, dh)
        k = qkv[:, E + h * dh:E + (h + 1) * dh]
        v = qkv[:, 2 * E + h * dh:2 * E + (h + 1) * dh]
        s = jax.lax.dot_general(q, k, (((1,), (1,)), ((), ())),
                                preferred_element_type=jnp.float32) * scale  # (L, L)
        s = s + neg
        s = s - jnp.max(s, axis=-1, keepdims=True)
        p = jnp.exp(s)
        p = p * pl.reciprocal(jnp.sum(p, axis=-1, keepdims=True), approx=True)
        heads.append(jnp.dot(p, v, preferred_element_type=jnp.float32))

    o = jnp.concatenate(heads, axis=-1)           # (L, E) lane-dense
    out = jnp.dot(o.astype(wo_ref.dtype), wo_ref[...],
                  preferred_element_type=jnp.float32) + bo_ref[...]
    o_ref[0] = (x_ref[0].astype(jnp.float32) + out).astype(o_ref.dtype)


def _ffn_kernel(x_ref, g_ref, b_ref, w1_ref, b1_ref, w2_ref, b2_ref, o_ref, *, eps):
    # fused: LayerNorm + W1 + ReLU + W2 + residual
    x = x_ref[...].astype(jnp.float32)
    mu = jnp.mean(x, axis=-1, keepdims=True)
    var = jnp.mean(jnp.square(x - mu), axis=-1, keepdims=True)
    h = (x - mu) * jax.lax.rsqrt(var + eps) * g_ref[...] + b_ref[...]
    h1 = jnp.dot(h.astype(w1_ref.dtype), w1_ref[...],
                 preferred_element_type=jnp.float32) + b1_ref[...]
    h1 = jnp.maximum(h1, 0.0)
    h2 = jnp.dot(h1.astype(w2_ref.dtype), w2_ref[...],
                 preferred_element_type=jnp.float32) + b2_ref[...]
    o_ref[...] = (x + h2).astype(o_ref.dtype)


# ------------------------------- wrappers -----------------------------------

def reshape_conv(x, w, b, *, block_rows=512):
    """Conv1d(4E, E, kernel_size=1) as a per-position matmul."""
    B, L, D = x.shape
    E = w.shape[1]
    M = B * L
    bm, Mp = _choose_rows(M, block_rows)
    x2d = _pad_rows(x.reshape(M, D), Mp)
    out = pl.pallas_call(
        _conv_kernel,
        out_shape=jax.ShapeDtypeStruct((Mp, E), ACT_DTYPE),
        grid=(Mp // bm,),
        in_specs=[
            pl.BlockSpec((bm, D), lambda i: (i, 0)),
            pl.BlockSpec((D, E), lambda i: (0, 0)),
            pl.BlockSpec((1, E), lambda i: (0, 0)),
        ],
        out_specs=pl.BlockSpec((bm, E), lambda i: (i, 0)),
        compiler_params=pltpu.CompilerParams(dimension_semantics=("parallel",)),
    )(x2d, w, b.reshape(1, E))
    return out[:M].reshape(B, L, E)


def ln_qkv(x2d, g, b, wqkv, bqkv, *, block_rows=512, eps=1e-5):
    M, E = x2d.shape
    N = wqkv.shape[1]                              # 3E
    bm, Mp = _choose_rows(M, block_rows)
    xp = _pad_rows(x2d, Mp)
    kernel = functools.partial(_ln_qkv_kernel, eps=eps)
    out = pl.pallas_call(
        kernel,
        out_shape=jax.ShapeDtypeStruct((Mp, N), ACT_DTYPE),
        grid=(Mp // bm,),
        in_specs=[
            pl.BlockSpec((bm, E), lambda i: (i, 0)),
            pl.BlockSpec((1, E), lambda i: (0, 0)),
            pl.BlockSpec((1, E), lambda i: (0, 0)),
            pl.BlockSpec((E, N), lambda i: (0, 0)),
            pl.BlockSpec((1, N), lambda i: (0, 0)),
        ],
        out_specs=pl.BlockSpec((bm, N), lambda i: (i, 0)),
        compiler_params=pltpu.CompilerParams(dimension_semantics=("parallel",)),
    )(xp, g.reshape(1, E), b.reshape(1, E), wqkv, bqkv.reshape(1, N))
    return out[:M]


def attention_residual(x, qkv, mask, wo, bo, n_heads):
    B, L, E = x.shape
    qkv3 = qkv.reshape(B, L, 3 * E)
    mask3 = mask.reshape(B, 1, L).astype(jnp.float32)   # kept un-broadcast: (B, 1, L)
    kernel = functools.partial(_attn_kernel, n_heads=n_heads,
                               scale=1.0 / math.sqrt(E // n_heads))
    return pl.pallas_call(
        kernel,
        out_shape=jax.ShapeDtypeStruct((B, L, E), ACT_DTYPE),
        grid=(B,),
        in_specs=[
            pl.BlockSpec((1, L, E), lambda i: (i, 0, 0)),
            pl.BlockSpec((1, L, 3 * E), lambda i: (i, 0, 0)),
            pl.BlockSpec((1, 1, L), lambda i: (i, 0, 0)),
            pl.BlockSpec((E, E), lambda i: (0, 0)),
            pl.BlockSpec((1, E), lambda i: (0, 0)),
        ],
        out_specs=pl.BlockSpec((1, L, E), lambda i: (i, 0, 0)),
        compiler_params=pltpu.CompilerParams(dimension_semantics=("parallel",)),
    )(x, qkv3, mask3, wo, bo.reshape(1, E))


def ffn_residual(x2d, g, b, w1, b1, w2, b2, *, block_rows=512, eps=1e-5):
    M, E = x2d.shape
    F = w1.shape[1]
    bm, Mp = _choose_rows(M, block_rows)
    xp = _pad_rows(x2d, Mp)
    kernel = functools.partial(_ffn_kernel, eps=eps)
    out = pl.pallas_call(
        kernel,
        out_shape=jax.ShapeDtypeStruct((Mp, E), ACT_DTYPE),
        grid=(Mp // bm,),
        in_specs=[
            pl.BlockSpec((bm, E), lambda i: (i, 0)),
            pl.BlockSpec((1, E), lambda i: (0, 0)),
            pl.BlockSpec((1, E), lambda i: (0, 0)),
            pl.BlockSpec((E, F), lambda i: (0, 0)),
            pl.BlockSpec((1, F), lambda i: (0, 0)),
            pl.BlockSpec((F, E), lambda i: (0, 0)),
            pl.BlockSpec((1, E), lambda i: (0, 0)),
        ],
        out_specs=pl.BlockSpec((bm, E), lambda i: (i, 0)),
        compiler_params=pltpu.CompilerParams(dimension_semantics=("parallel",)),
    )(xp, g.reshape(1, E), b.reshape(1, E), w1, b1.reshape(1, F), w2, b2.reshape(1, E))
    return out[:M]


# ----------------------------- module forward ------------------------------

def encoder_block(x, mask, p, n_heads):
    B, L, E = x.shape
    # sublayer 1: LN1 -> fused QKV -> attention + out-proj + residual
    qkv = ln_qkv(x.reshape(B * L, E), p["ln1_g"], p["ln1_b"], p["wqkv"], p["bqkv"])
    x = attention_residual(x, qkv, mask, p["wo"], p["bo"], n_heads)
    # sublayer 2: LN2 -> W1 -> ReLU -> W2 -> residual (single fused kernel)
    x2d = ffn_residual(x.reshape(B * L, E), p["ln2_g"], p["ln2_b"],
                       p["w1"], p["b1"], p["w2"], p["b2"])
    return x2d.reshape(B, L, E)


def model_encoder(x, mask, params, first_pass=False, n_heads=4):
    """x: (B, L, 4*E) if first_pass else (B, L, E);  mask: (B, L)."""
    x = x.astype(ACT_DTYPE)
    if first_pass:
        x = reshape_conv(x, params["conv_w"], params["conv_b"])
    for blk in params["blocks"]:
        x = encoder_block(x, mask, blk, n_heads)
    return x


# ----------------------------- parameter init ------------------------------

def init_params(key, emb_dim, n_blocks, ffn_mult=4):
    E = emb_dim
    keys = jax.random.split(key, 1 + n_blocks)

    def w(k, shape):
        return (0.02 * jax.random.normal(k, shape, jnp.float32)).astype(ACT_DTYPE)

    params = {
        "conv_w": w(keys[0], (4 * E, E)),
        "conv_b": jnp.zeros((E,), jnp.float32),
        "blocks": [],
    }
    for i in range(n_blocks):
        bk = jax.random.split(keys[1 + i], 4)
        params["blocks"].append({
            "ln1_g": jnp.ones((E,), jnp.float32), "ln1_b": jnp.zeros((E,), jnp.float32),
            "ln2_g": jnp.ones((E,), jnp.float32), "ln2_b": jnp.zeros((E,), jnp.float32),
            "wqkv": w(bk[0], (E, 3 * E)), "bqkv": jnp.zeros((3 * E,), jnp.float32),
            "wo": w(bk[1], (E, E)),       "bo": jnp.zeros((E,), jnp.float32),
            "w1": w(bk[2], (E, ffn_mult * E)), "b1": jnp.zeros((ffn_mult * E,), jnp.float32),
            "w2": w(bk[3], (ffn_mult * E, E)), "b2": jnp.zeros((E,), jnp.float32),
        })
    return params


# ---------------------------------- main -----------------------------------

if __name__ == "__main__":
    B, L, E = 2, 8, 32          # batch, words_per_doc, resized_emb_dim
    n_blocks, n_heads = 2, 4

    key = jax.random.PRNGKey(0)
    k_x, k_p = jax.random.split(key)

    x = jax.random.normal(k_x, (B, L, 4 * E), jnp.float32)    # (batch, #words, 4*emb_dim)
    mask = jnp.ones((B, L), jnp.float32).at[1, -2:].set(0.0)  # pad last 2 tokens of doc 1

    params = init_params(k_p, E, n_blocks)

    out = model_encoder(x, mask, params, first_pass=True, n_heads=n_heads)
    out = jax.block_until_ready(out)
    assert out.shape == (B, L, E)
    assert bool(jnp.all(jnp.isfinite(out.astype(jnp.float32))))
    print("KERNEL_OK")
</pallas_src>

<mosaic_0001>
module attributes {stable_mosaic.version = 11 : i64} {
  func.func @_conv_kernel(%arg0: i32, %arg1: memref<16x128xbf16, #tpu.memory_space<vmem>>, %arg2: memref<128x32xbf16, #tpu.memory_space<vmem>>, %arg3: memref<1x32xf32, #tpu.memory_space<vmem>>, %arg4: memref<16x32xbf16, #tpu.memory_space<vmem>>) attributes {dimension_semantics = [#tpu.dimension_semantics<parallel>], iteration_bounds = array<i64: 1>, scalar_prefetch = 0 : i64, scratch_operands = 0 : i64, tpu.core_type = #tpu.core_type<tc>, window_params = [{transform_indices = @transform_0, window_bounds = array<i64: 16, 128>}, {pipeline_mode = #tpu.pipeline_mode<synchronous>, transform_indices = @transform_1, window_bounds = array<i64: 128, 32>}, {pipeline_mode = #tpu.pipeline_mode<synchronous>, transform_indices = @transform_2, window_bounds = array<i64: 1, 32>}, {transform_indices = @transform_3, window_bounds = array<i64: 16, 32>}]} {
    %c0 = arith.constant 0 : index
    %c0_0 = arith.constant 0 : index
    %0 = vector.load %arg1[%c0, %c0_0] : memref<16x128xbf16, #tpu.memory_space<vmem>>, vector<16x128xbf16>
    %c0_1 = arith.constant 0 : index
    %c0_2 = arith.constant 0 : index
    %1 = vector.load %arg2[%c0_1, %c0_2] : memref<128x32xbf16, #tpu.memory_space<vmem>>, vector<128x32xbf16>
    %cst = arith.constant dense<0.000000e+00> : vector<16x32xf32>
    %2 = tpu.matmul %0, %1, %cst {dimension_numbers = #tpu.dot_dimension_numbers<[1], [0], [0], [1], [0, 0, 1, 1], [], []>} : vector<16x128xbf16>, vector<128x32xbf16>, vector<16x32xf32> -> vector<16x32xf32>
    %c0_3 = arith.constant 0 : index
    %c0_4 = arith.constant 0 : index
    %3 = vector.load %arg3[%c0_3, %c0_4] : memref<1x32xf32, #tpu.memory_space<vmem>>, vector<1x32xf32>
    %4 = vector.broadcast %3 : vector<1x32xf32> to vector<16x32xf32>
    %5 = arith.addf %2, %4 : vector<16x32xf32>
    %6 = arith.truncf %5 : vector<16x32xf32> to vector<16x32xbf16>
    %c0_5 = arith.constant 0 : index
    %c0_6 = arith.constant 0 : index
    %7 = vector.load %arg4[%c0_5, %c0_6] : memref<16x32xbf16, #tpu.memory_space<vmem>>, vector<16x32xbf16>
    tpu.vector_store %arg4[%c0_5, %c0_6], %6 {strides = array<i32>} : memref<16x32xbf16, #tpu.memory_space<vmem>>, vector<16x32xbf16>,
    return
  }
  func.func @transform_0(%arg0: i32) -> (i32, i32) {
    %c0_i32 = arith.constant 0 : i32
    %c0_i32_0 = arith.constant 0 : i32
    return %arg0, %c0_i32 : i32, i32
  }
  func.func @transform_1(%arg0: i32) -> (i32, i32) {
    %c0_i32 = arith.constant 0 : i32
    %c0_i32_0 = arith.constant 0 : i32
    %c0_i32_1 = arith.constant 0 : i32
    return %c0_i32, %c0_i32_0 : i32, i32
  }
  func.func @transform_2(%arg0: i32) -> (i32, i32) {
    %c0_i32 = arith.constant 0 : i32
    %c0_i32_0 = arith.constant 0 : i32
    %c0_i32_1 = arith.constant 0 : i32
    return %c0_i32, %c0_i32_0 : i32, i32
  }
  func.func @transform_3(%arg0: i32) -> (i32, i32) {
    %c0_i32 = arith.constant 0 : i32
    %c0_i32_0 = arith.constant 0 : i32
    return %arg0, %c0_i32 : i32, i32
  }
}

</mosaic_0001>

<bundles_post_ra>
// kernel: tpu_custom_call.1
= control target key start
LH: loop header
LB: loop body
LE: loop exit
PB: predicated region body
PF: predicated region fallthrough
CT: control target
= control target key end

     0   :  { %v244_v1 = vmov 0.0   ;;  %vm245_vm0 = vmmov 0   ;;  %s311_s0 = inlined_call_operand.vmem [shape: bf16[16,128], index: 0, kind: input, shape index: {}]   ;;  %s312_s1 = inlined_call_operand.vmem [shape: bf16[128,32], index: 1, kind: input, shape index: {}]   ;;  %s313_s2 = inlined_call_operand.vmem [shape: f32[1,32], index: 2, kind: input, shape index: {}]   ;;  %s314_s3 = inlined_call_operand.hbm [shape: bf16[16,32], index: 3, kind: output, shape index: {}]  }
   0x1   :  { %v211_v0 = vld [vmem:[%s312_s1] sm:$0xff]   ;;  %186 = vmatprep.subr.bf16.mxu0 %v244_v1  ;;  %v212_v2 = vld [vmem:[%s312_s1 + $0x8] sm:$0xff]   ;;  %202 = vmatprep.mubr.msk.bf16.mxu0 %vm245_vm0, %v244_v1  ;;  %v213_v3 = vld [vmem:[%s312_s1 + $0x10] sm:$0xff]  }
   0x2   :  { %187 = vmatpush3.bf16.msra.mxu0 %v211_v0 }
   0x3   :  { %188 = vmatprep.subr.bf16.mxu0 %v244_v1 }
   0x6   :  { %189 = vmatpush3.bf16.msra.mxu0 %v212_v2 }
   0x7   :  { %190 = vmatprep.subr.bf16.mxu0 %v244_v1 }
   0x8   :  { %8 = vsyncpa [#allocation3], 0  ;;  %v214_v4 = vld [vmem:[%s312_s1 + $0x18] sm:$0xff]   ;;  %v215_v5 = vld [vmem:[%s312_s1 + $0x20] sm:$0xff]   ;;  %s246_s5 = smov [#allocation2]   ;;  %vm144_vm1 = vcmask 257024  }
   0x9   :  { %v216_v6 = vld [vmem:[%s312_s1 + $0x28] sm:$0xff]   ;;  %v217_v7 = vld [vmem:[%s312_s1 + $0x30] sm:$0xff]   ;;  %v218_v8 = vld [vmem:[%s312_s1 + $0x38] sm:$0xff]   ;;  %s152_s6 = sshll.u32 %s246_s5, 4  ;;  %s153_s6 = int_to_ptr.vmem [resolvable:$true] %s152_s6 }
   0xa   :  { %191 = vmatpush3.bf16.msra.mxu0 %v213_v3  ;;  %v219_v9 = vld [vmem:[%s311_s0] sm:$0xff]   ;;  %s220_s0 = scalar_lea.vmem %s153_s6, 128  ;;  %p225_p1 = scmp.lt.s32.totalorder %s153_s6, %s153_s6 }
   0xb   :  { %192 = vmatprep.subr.bf16.mxu0 %v244_v1  ;;  %v163_v10 = vld [vmem:[%s313_s2] ss:$0 sm:$0xff]  ;;  %p221_p0 = scmp.ne.s32.totalorder %s153_s6, %s220_s0  ;;  %p226_p2 = scmp.lt.s32.totalorder %s220_s0, %s220_s0 }
   0xd   :  { %p227_p3 = por %p226_p2, %p225_p1 }
   0xe   :  { %193 = vmatpush3.bf16.msra.mxu0 %v214_v4 }
   0xf   :  { %194 = vmatprep.subr.bf16.mxu0 %v244_v1  ;;  %p228_p4 = pnand %p227_p3, %p221_p0 }
  0x12   :  { %195 = vmatpush3.bf16.msra.mxu0 %v215_v5 }
  0x13   :  { %196 = vmatprep.subr.bf16.mxu0 %v244_v1 }
  0x16   :  { %197 = vmatpush3.bf16.msra.mxu0 %v216_v6 }
  0x17   :  { %198 = vmatprep.subr.bf16.mxu0 %v244_v1 }
  0x1a   :  { %199 = vmatpush3.bf16.msra.mxu0 %v217_v7 }
  0x1b   :  { %200 = vmatprep.subr.bf16.mxu0 %v244_v1 }
  0x1e   :  { %201 = vmatpush3.bf16.msra.mxu0 %v218_v8 }
  0x21   :  { %203 = vmatmul.mubr.bf16.vlgmr.msra.gmra.mrb[0].mxu0 %v219_v9 }
  0xf4   :  { %v129_v11 = vpop.f32.mrb[0].mxu0 }
  0xf5   :  { %v130_v12 = vadd.f32 %v163_v10, %v129_v11  ;;  %v204_v13 = vpop.f32.mrb[1].mxu0 }
  0xf6   :  { %v132_v14 = vpop.f32.mrb[2].mxu0 }
  0xf7   :  { %v175_v15 = vpack.c.bf16 %v130_v12, %v130_v12  ;;  %v133_v16 = vadd.f32 %v163_v10, %v132_v14  ;;  %v205_v17 = vpop.f32.mrb[3].mxu0 }
  0xf9   :  { %145 = vst.msk [vmem:[#allocation2] sm:$0xf] %vm144_vm1, %v175_v15  ;;  %v176_v18 = vpack.c.bf16 %v133_v16, %v133_v16 }
  0xfb   :  { %146 = vst.msk [vmem:[#allocation2 + $0x4] sm:$0xf] %vm144_vm1, %v176_v18 }
  0xfc   :  { %231 = shalt.err (!%p228_p4)
}
  0xfd   :  { %s232_s7 = scalar_lea.hbm %s314_s3, 128 }
  0xfe   :  { %p233_p5 = scmp.ne.s32.totalorder %s314_s3, %s232_s7  ;;  %p236_p6 = scmp.lt.u32.totalorder %s232_s7, %s314_s3 }
 0x100   :  { %p238_p7 = pnand %p236_p6, %p233_p5 }
 0x102   :  { %241 = shalt.err (!%p238_p7)
}
 0x103   :  { %s247_s12 = smov 64   ;;  %s248_s13 = smov 4  }
 0x104   :  { %158 = dma.vmem_to_hbm [thread:$0]  %s153_s6, 128, %s314_s3, [#allocation3], %s247_s12, %s247_s12, %s248_s13  }
 0x105   :  { %242 = dma.done.wait [#allocation3], 128  }
 0x106   :  { %243 = vsyncadd [#allocation3], 4294967168 }
 0x107   :  { %162 = vsyncpa [#allocation3], 1 }

</bundles_post_ra>
